<compile_context>
chip_gen: v6e
topology: v6e:2x2x1
jax: 0.10.0
libtpu: 0.0.40
codegen_flags: <defaults>
</compile_context>

<pallas_src>
import functools

import numpy as np
import jax
import jax.numpy as jnp
from jax.experimental import pallas as pl
from jax.experimental.pallas import tpu as pltpu

NUM_CLASSES = 4
NUM_ANCHORS = 3
VEC = 5 + NUM_CLASSES            # [conf, tx, ty, tw, th, cls...]
HEAD_OUT = NUM_ANCHORS * VEC     # 27
HEAD_PAD = 32                    # head rows padded to a full sublane multiple
HIDDEN = 32
MAX_TILE = 2048                  # lanes per grid step (upper bound)

ANCHORS = {
    13: ((10.0, 13.0), (16.0, 30.0), (33.0, 23.0)),
    26: ((30.0, 61.0), (62.0, 45.0), (59.0, 119.0)),
    52: ((116.0, 90.0), (156.0, 198.0), (373.0, 326.0)),
}
SCALES = ((32, 13), (16, 26), (8, 52))      # (stride, anchor-dict key)


def _round_up(x, m):
    return (x + m - 1) // m * m


def _plan(x_shape):
    """Static per-scale row counts, lane tile, padded sizes and offsets."""
    N, C, H, W = x_shape
    rs = [N * (H // s) * (W // s) for s, _ in SCALES]
    # >=128 lanes, <=MAX_TILE, aim for >=2 grid steps overall (v7x megacore).
    tile = min(MAX_TILE, max(128, _round_up(-(-max(rs) // 2), 128)))
    pads = [_round_up(r, tile) for r in rs]
    offs, o = [], 0
    for p in pads:
        offs.append(o)
        o += p
    return tile, rs, pads, offs, o


# ----------------------------------------------------------------------------
# Fused kernel: stem 1x1 conv + head 1x1 conv + YOLO decode, all scales,
# one grid step per lane tile.  Scale selection via scalar-prefetched table.
# ----------------------------------------------------------------------------
def _detector_kernel(sid_ref, x_ref, ws_ref, bs_ref, wh_ref, bh_ref, cst_ref,
                     out_ref, *, thresh):
    """sid_ref : (num_tiles,) SMEM      tile -> scale id (used only by index_maps)
       x_ref   : (8, TILE)              rows 0-2 channels, 3 w_idx, 4 h_idx, 5 n_idx
       ws_ref  : (1, HIDDEN, 3)         stem weight (transposed) for this scale
       bs_ref  : (1, HIDDEN, 1)
       wh_ref  : (1, HEAD_PAD, HIDDEN)  head weight (transposed, zero-padded rows)
       bh_ref  : (1, HEAD_PAD, 1)
       cst_ref : (1, 8, 1)              [t/case, aw0/c, aw1/c, aw2/c, ah0/c, ah1/c, ah2/c, 0]
       out_ref : (3, 8, TILE)           per-anchor [n, conf, cx, cy, w, h, cls, mask]
    """
    x = x_ref[...]                                   # (8, TILE) f32
    ws = ws_ref[0]                                   # (HIDDEN, 3)
    bs = bs_ref[0]                                   # (HIDDEN, 1)
    wh = wh_ref[0]                                   # (HEAD_PAD, HIDDEN)
    bh = bh_ref[0]                                   # (HEAD_PAD, 1)
    cst = cst_ref[0]                                 # (8, 1)

    # Stem 1x1 conv, Cin == 3 -> three VPU broadcast FMAs (skip MXU), relu6.
    hid = (ws[:, 0:1] * x[0:1, :] + ws[:, 1:2] * x[1:2, :]
           + ws[:, 2:3] * x[2:3, :] + bs)
    hid = jnp.clip(hid, 0.0, 6.0)

    # Head 1x1 conv in f32 (bf16 path removed); M padded to 32 rows.
    head = jnp.dot(wh, hid, preferred_element_type=jnp.float32) + bh   # (32, TILE)

    w_row = x[3:4, :]
    h_row = x[4:5, :]
    n_row = x[5:6, :]
    toc = cst[0:1, :]                                # stride / case, shape (1, 1)

    for a in range(NUM_ANCHORS):                     # static unroll, 3 anchors
        o = a * VEC
        conf = jax.nn.sigmoid(head[o:o + 1, :])
        mask = (conf > thresh).astype(jnp.float32)                   # _filter
        cx = (w_row + head[o + 1:o + 2, :]) * toc                    # _parse
        cy = (h_row + head[o + 2:o + 3, :]) * toc
        bw_box = cst[1 + a:2 + a, :] * jnp.exp(head[o + 3:o + 4, :])
        bh_box = cst[4 + a:5 + a, :] * jnp.exp(head[o + 4:o + 5, :])
        # argmax on raw logits (softmax is monotonic -> identical class index).
        cls = head[o + 5:o + 5 + NUM_CLASSES, :]                     # (4, TILE)
        cmax = jnp.max(cls, axis=0, keepdims=True)
        ridx = jax.lax.broadcasted_iota(jnp.int32, cls.shape, 0)
        cls_idx = jnp.min(jnp.where(cls >= cmax, ridx, NUM_CLASSES),
                          axis=0, keepdims=True).astype(jnp.float32)
        # Direct sublane-slice stores (no concatenate / vreg reshuffle).
        out_ref[a, 0:1, :] = n_row
        out_ref[a, 1:2, :] = conf
        out_ref[a, 2:3, :] = cx
        out_ref[a, 3:4, :] = cy
        out_ref[a, 4:5, :] = bw_box
        out_ref[a, 5:6, :] = bh_box
        out_ref[a, 6:7, :] = cls_idx
        out_ref[a, 7:8, :] = mask


# ----------------------------------------------------------------------------
# Device-side pipeline: pooling backbone stand-in + single fused pallas_call.
# ----------------------------------------------------------------------------
@functools.partial(jax.jit, static_argnames=("thresh", "case"))
def detector_dense(x_nchw, params, *, thresh, case):
    x = x_nchw.astype(jnp.float32)
    N, C, H, W = x.shape
    tile, rs, pads, offs, total = _plan(x.shape)

    row_blocks, sid_list, cst_rows = [], [], []
    ws_l, bs_l, wh_l, bh_l = [], [], [], []
    for k, ((stride, akey), r, r_pad) in enumerate(zip(SCALES, rs, pads)):
        Hs, Ws = H // stride, W // stride
        # Backbone stand-in: average pooling done directly in NCHW -> channel-major
        # rows, no full-image NHWC transpose and no (R,3)->(3,R) relayout.
        pooled = x.reshape(N, C, Hs, stride, Ws, stride).mean(axis=(3, 5))
        chans = jnp.moveaxis(pooled, 1, 0).reshape(C, -1)            # (3, R)
        # Spatial index rows precomputed -> no runtime div/mod in the kernel.
        w_i = jax.lax.broadcasted_iota(jnp.float32, (N, Hs, Ws), 2).reshape(1, -1)
        h_i = jax.lax.broadcasted_iota(jnp.float32, (N, Hs, Ws), 1).reshape(1, -1)
        n_i = jax.lax.broadcasted_iota(jnp.float32, (N, Hs, Ws), 0).reshape(1, -1)
        blk = jnp.concatenate(
            [chans, w_i, h_i, n_i, jnp.zeros((2, r), jnp.float32)], axis=0)  # (8, R)
        if r_pad != r:
            blk = jnp.pad(blk, ((0, 0), (0, r_pad - r)))
        row_blocks.append(blk)
        sid_list += [k] * (r_pad // tile)

        p = params[stride]
        ws_l.append(p["w_stem"].T)                                   # (HIDDEN, 3)
        bs_l.append(p["b_stem"].reshape(HIDDEN, 1))
        wh_l.append(jnp.pad(p["w_head"].T,
                            ((0, HEAD_PAD - HEAD_OUT), (0, 0))))     # (32, HIDDEN)
        bh_l.append(jnp.pad(p["b_head"].reshape(HEAD_OUT, 1),
                            ((0, HEAD_PAD - HEAD_OUT), (0, 0))))
        an = ANCHORS[akey]
        cst_rows.append([stride / case,
                         an[0][0] / case, an[1][0] / case, an[2][0] / case,
                         an[0][1] / case, an[1][1] / case, an[2][1] / case, 0.0])

    rows_all = jnp.concatenate(row_blocks, axis=1)                   # (8, total)
    sid = jnp.asarray(sid_list, dtype=jnp.int32)                     # (num_tiles,)
    ws_all = jnp.stack(ws_l)                                         # (3, 32, 3)
    bs_all = jnp.stack(bs_l)                                         # (3, 32, 1)
    wh_all = jnp.stack(wh_l)                                         # (3, 32, 32)
    bh_all = jnp.stack(bh_l)                                         # (3, 32, 1)
    cst_all = jnp.asarray(cst_rows, jnp.float32).reshape(len(SCALES), 8, 1)

    kern = functools.partial(_detector_kernel, thresh=float(thresh))
    out = pl.pallas_call(
        kern,
        grid_spec=pltpu.PrefetchScalarGridSpec(
            num_scalar_prefetch=1,
            grid=(total // tile,),
            in_specs=[
                pl.BlockSpec((8, tile), lambda i, s: (0, i)),                  # rows
                pl.BlockSpec((1, HIDDEN, 3), lambda i, s: (s[i], 0, 0)),       # stem W
                pl.BlockSpec((1, HIDDEN, 1), lambda i, s: (s[i], 0, 0)),       # stem b
                pl.BlockSpec((1, HEAD_PAD, HIDDEN), lambda i, s: (s[i], 0, 0)),  # head W
                pl.BlockSpec((1, HEAD_PAD, 1), lambda i, s: (s[i], 0, 0)),     # head b
                pl.BlockSpec((1, 8, 1), lambda i, s: (s[i], 0, 0)),            # decode consts
            ],
            out_specs=pl.BlockSpec((NUM_ANCHORS, 8, tile), lambda i, s: (0, 0, i)),
        ),
        out_shape=jax.ShapeDtypeStruct((NUM_ANCHORS, 8, total), jnp.float32),
        compiler_params=pltpu.CompilerParams(
            dimension_semantics=("parallel",)),
    )(sid, rows_all, ws_all, bs_all, wh_all, bh_all, cst_all)
    return out


# ----------------------------------------------------------------------------
# Host-side glue: relayout + dynamic-shape boolean filter + NMS.
# TODO(synk): mask.nonzero()/boolean-select and greedy NMS are data-dependent
# dynamic-shape ops; done on host. Reference repo's nms(..., mode='inter') source
# is not provided; standard greedy NMS with inter/min-area IoU is used.
# ----------------------------------------------------------------------------
def _iou_inter(box, rest):
    bx1, by1 = box[2] - box[4] / 2, box[3] - box[5] / 2
    bx2, by2 = box[2] + box[4] / 2, box[3] + box[5] / 2
    rx1, ry1 = rest[:, 2] - rest[:, 4] / 2, rest[:, 3] - rest[:, 5] / 2
    rx2, ry2 = rest[:, 2] + rest[:, 4] / 2, rest[:, 3] + rest[:, 5] / 2
    iw = np.clip(np.minimum(bx2, rx2) - np.maximum(bx1, rx1), 0, None)
    ih = np.clip(np.minimum(by2, ry2) - np.maximum(by1, ry1), 0, None)
    inter = iw * ih
    area_b = max((bx2 - bx1) * (by2 - by1), 1e-9)
    area_r = np.maximum((rx2 - rx1) * (ry2 - ry1), 1e-9)
    return inter / np.minimum(area_b, area_r)


def nms_numpy(boxes, thresh=0.4):
    if boxes.shape[0] == 0:
        return boxes
    boxes = boxes[np.argsort(-boxes[:, 1])]
    keep = []
    while boxes.shape[0] > 0:
        cur = boxes[0]
        keep.append(cur)
        if boxes.shape[0] == 1:
            break
        rest = boxes[1:]
        boxes = rest[_iou_inter(cur, rest) < thresh]
    return np.stack(keep, axis=0)


def detector_forward(x_nchw, thresh, case, params):
    tile, rs, pads, offs, total = _plan(tuple(x_nchw.shape))
    out = jax.block_until_ready(
        detector_dense(x_nchw, params, thresh=float(thresh), case=float(case)))
    out_np = np.asarray(out)                          # (3, 8, total), raw kernel layout
    kept = []
    for off, r in zip(offs, rs):
        blk = out_np[:, :, off:off + r]               # (anchors, 8, R): pad lanes sliced off
        # Relayout on host (free off the TPU critical path); row order (n, h, w, anchor)
        # matches the reference mask.nonzero() ordering.
        dense = np.transpose(blk, (2, 0, 1)).reshape(r * NUM_ANCHORS, 8)
        kept.append(dense[dense[:, 7] > 0.5, :7])     # apply _filter mask, keep 7 cols
    boxes = np.concatenate(kept, axis=0)
    return nms_numpy(boxes, 0.4)


def make_params(key):
    params = {}
    for i, stride in enumerate((32, 16, 8)):
        k1, k2, k3, k4 = jax.random.split(jax.random.fold_in(key, i), 4)
        params[stride] = dict(
            w_stem=jax.random.normal(k1, (3, HIDDEN), jnp.float32) * 0.5,
            b_stem=jax.random.normal(k2, (HIDDEN,), jnp.float32) * 0.1,
            w_head=jax.random.normal(k3, (HIDDEN, HEAD_OUT), jnp.float32) * 0.3,
            b_head=jax.random.normal(k4, (HEAD_OUT,), jnp.float32) * 0.1,
        )
    return params


if __name__ == "__main__":
    key = jax.random.PRNGKey(0)
    k_img, k_par = jax.random.split(key)

    # small NCHW image, like the PyTorch module's input
    x = jax.random.normal(k_img, (2, 3, 64, 64), jnp.float32)
    params = make_params(k_par)

    boxes = detector_forward(x, thresh=0.45, case=64.0, params=params)
    assert boxes.ndim == 2 and (boxes.shape[0] == 0 or boxes.shape[1] == 7)
    print("KERNEL_OK")
</pallas_src>

<mosaic_0001>
module attributes {stable_mosaic.version = 11 : i64} {
  func.func @_detector_kernel(%arg0: i32, %arg1: memref<3xi32, #tpu.memory_space<smem>>, %arg2: memref<8x128xf32, #tpu.memory_space<vmem>>, %arg3: memref<1x32x3xf32, #tpu.memory_space<vmem>>, %arg4: memref<1x32x1xf32, #tpu.memory_space<vmem>>, %arg5: memref<1x32x32xf32, #tpu.memory_space<vmem>>, %arg6: memref<1x32x1xf32, #tpu.memory_space<vmem>>, %arg7: memref<1x8x1xf32, #tpu.memory_space<vmem>>, %arg8: memref<3x8x128xf32, #tpu.memory_space<vmem>>) attributes {dimension_semantics = [#tpu.dimension_semantics<parallel>], iteration_bounds = array<i64: 3>, scalar_prefetch = 1 : i64, scratch_operands = 0 : i64, tpu.core_type = #tpu.core_type<tc>, window_params = [{transform_indices = @transform_0, window_bounds = array<i64: 8, 128>}, {transform_indices = @transform_1, window_bounds = array<i64: 1, 32, 3>}, {transform_indices = @transform_2, window_bounds = array<i64: 1, 32, 1>}, {transform_indices = @transform_3, window_bounds = array<i64: 1, 32, 32>}, {transform_indices = @transform_4, window_bounds = array<i64: 1, 32, 1>}, {transform_indices = @transform_5, window_bounds = array<i64: 1, 8, 1>}, {transform_indices = @transform_6, window_bounds = array<i64: 3, 8, 128>}]} {
    %c0 = arith.constant 0 : index
    %c0_0 = arith.constant 0 : index
    %0 = vector.load %arg2[%c0, %c0_0] : memref<8x128xf32, #tpu.memory_space<vmem>>, vector<8x128xf32>
    %c0_1 = arith.constant 0 : index
    %c0_2 = arith.constant 0 : index
    %c0_3 = arith.constant 0 : index
    %1 = vector.load %arg3[%c0_1, %c0_2, %c0_3] : memref<1x32x3xf32, #tpu.memory_space<vmem>>, vector<1x32x3xf32>
    %2 = vector.shape_cast %1 : vector<1x32x3xf32> to vector<32x3xf32>
    %c0_4 = arith.constant 0 : index
    %c0_5 = arith.constant 0 : index
    %c0_6 = arith.constant 0 : index
    %3 = vector.load %arg4[%c0_4, %c0_5, %c0_6] : memref<1x32x1xf32, #tpu.memory_space<vmem>>, vector<1x32x1xf32>
    %4 = vector.shape_cast %3 : vector<1x32x1xf32> to vector<32x1xf32>
    %c0_7 = arith.constant 0 : index
    %c0_8 = arith.constant 0 : index
    %c0_9 = arith.constant 0 : index
    %5 = vector.load %arg5[%c0_7, %c0_8, %c0_9] : memref<1x32x32xf32, #tpu.memory_space<vmem>>, vector<1x32x32xf32>
    %6 = vector.shape_cast %5 : vector<1x32x32xf32> to vector<32x32xf32>
    %c0_10 = arith.constant 0 : index
    %c0_11 = arith.constant 0 : index
    %c0_12 = arith.constant 0 : index
    %7 = vector.load %arg6[%c0_10, %c0_11, %c0_12] : memref<1x32x1xf32, #tpu.memory_space<vmem>>, vector<1x32x1xf32>
    %8 = vector.shape_cast %7 : vector<1x32x1xf32> to vector<32x1xf32>
    %c0_13 = arith.constant 0 : index
    %c0_14 = arith.constant 0 : index
    %c0_15 = arith.constant 0 : index
    %9 = vector.load %arg7[%c0_13, %c0_14, %c0_15] : memref<1x8x1xf32, #tpu.memory_space<vmem>>, vector<1x8x1xf32>
    %10 = vector.shape_cast %9 : vector<1x8x1xf32> to vector<8x1xf32>
    %11 = vector.extract_strided_slice %2 {offsets = [0, 0], sizes = [32, 1], strides = [1, 1]} : vector<32x3xf32> to vector<32x1xf32>
    %12 = vector.extract_strided_slice %0 {offsets = [0, 0], sizes = [1, 128], strides = [1, 1]} : vector<8x128xf32> to vector<1x128xf32>
    %13 = vector.broadcast %11 : vector<32x1xf32> to vector<32x128xf32>
    %14 = vector.broadcast %12 : vector<1x128xf32> to vector<32x128xf32>
    %15 = arith.mulf %13, %14 : vector<32x128xf32>
    %16 = vector.extract_strided_slice %2 {offsets = [0, 1], sizes = [32, 1], strides = [1, 1]} : vector<32x3xf32> to vector<32x1xf32>
    %17 = vector.extract_strided_slice %0 {offsets = [1, 0], sizes = [1, 128], strides = [1, 1]} : vector<8x128xf32> to vector<1x128xf32>
    %18 = vector.broadcast %16 : vector<32x1xf32> to vector<32x128xf32>
    %19 = vector.broadcast %17 : vector<1x128xf32> to vector<32x128xf32>
    %20 = arith.mulf %18, %19 : vector<32x128xf32>
    %21 = arith.addf %15, %20 : vector<32x128xf32>
    %22 = vector.extract_strided_slice %2 {offsets = [0, 2], sizes = [32, 1], strides = [1, 1]} : vector<32x3xf32> to vector<32x1xf32>
    %23 = vector.extract_strided_slice %0 {offsets = [2, 0], sizes = [1, 128], strides = [1, 1]} : vector<8x128xf32> to vector<1x128xf32>
    %24 = vector.broadcast %22 : vector<32x1xf32> to vector<32x128xf32>
    %25 = vector.broadcast %23 : vector<1x128xf32> to vector<32x128xf32>
    %26 = arith.mulf %24, %25 : vector<32x128xf32>
    %27 = arith.addf %21, %26 : vector<32x128xf32>
    %28 = vector.broadcast %4 : vector<32x1xf32> to vector<32x128xf32>
    %29 = arith.addf %27, %28 : vector<32x128xf32>
    %cst = arith.constant 0.000000e+00 : f32
    %cst_16 = arith.constant 6.000000e+00 : f32
    %30 = vector.broadcast %cst : f32 to vector<32x128xf32>
    %31 = arith.maximumf %30, %29 : vector<32x128xf32>
    %32 = vector.broadcast %cst_16 : f32 to vector<32x128xf32>
    %33 = arith.minimumf %32, %31 : vector<32x128xf32>
    %cst_17 = arith.constant dense<0.000000e+00> : vector<32x128xf32>
    %34 = tpu.matmul %6, %33, %cst_17 {dimension_numbers = #tpu.dot_dimension_numbers<[1], [0], [0], [1], [0, 0, 1, 1], [], []>} : vector<32x32xf32>, vector<32x128xf32>, vector<32x128xf32> -> vector<32x128xf32>
    %35 = vector.broadcast %8 : vector<32x1xf32> to vector<32x128xf32>
    %36 = arith.addf %34, %35 : vector<32x128xf32>
    %37 = vector.extract_strided_slice %0 {offsets = [3, 0], sizes = [1, 128], strides = [1, 1]} : vector<8x128xf32> to vector<1x128xf32>
    %38 = vector.extract_strided_slice %0 {offsets = [4, 0], sizes = [1, 128], strides = [1, 1]} : vector<8x128xf32> to vector<1x128xf32>
    %39 = vector.extract_strided_slice %0 {offsets = [5, 0], sizes = [1, 128], strides = [1, 1]} : vector<8x128xf32> to vector<1x128xf32>
    %40 = vector.extract_strided_slice %10 {offsets = [0, 0], sizes = [1, 1], strides = [1, 1]} : vector<8x1xf32> to vector<1x1xf32>
    %41 = vector.extract_strided_slice %36 {offsets = [0, 0], sizes = [1, 128], strides = [1, 1]} : vector<32x128xf32> to vector<1x128xf32>
    %42 = arith.negf %41 : vector<1x128xf32>
    %43 = math.exp %42 : vector<1x128xf32>
    %cst_18 = arith.constant 1.000000e+00 : f32
    %44 = vector.broadcast %cst_18 : f32 to vector<1x128xf32>
    %45 = arith.addf %44, %43 : vector<1x128xf32>
    %46 = arith.divf %44, %45 : vector<1x128xf32>
    %cst_19 = arith.constant 4.500000e-01 : f32
    %47 = vector.broadcast %cst_19 : f32 to vector<1x128xf32>
    %48 = arith.cmpf ogt, %46, %47 : vector<1x128xf32>
    %49 = arith.extui %48 : vector<1x128xi1> to vector<1x128xi32>
    %50 = arith.sitofp %49 : vector<1x128xi32> to vector<1x128xf32>
    %51 = vector.extract_strided_slice %36 {offsets = [1, 0], sizes = [1, 128], strides = [1, 1]} : vector<32x128xf32> to vector<1x128xf32>
    %52 = arith.addf %37, %51 : vector<1x128xf32>
    %53 = vector.broadcast %40 : vector<1x1xf32> to vector<1x128xf32>
    %54 = arith.mulf %52, %53 : vector<1x128xf32>
    %55 = vector.extract_strided_slice %36 {offsets = [2, 0], sizes = [1, 128], strides = [1, 1]} : vector<32x128xf32> to vector<1x128xf32>
    %56 = arith.addf %38, %55 : vector<1x128xf32>
    %57 = vector.broadcast %40 : vector<1x1xf32> to vector<1x128xf32>
    %58 = arith.mulf %56, %57 : vector<1x128xf32>
    %59 = vector.extract_strided_slice %10 {offsets = [1, 0], sizes = [1, 1], strides = [1, 1]} : vector<8x1xf32> to vector<1x1xf32>
    %60 = vector.extract_strided_slice %36 {offsets = [3, 0], sizes = [1, 128], strides = [1, 1]} : vector<32x128xf32> to vector<1x128xf32>
    %61 = math.exp %60 : vector<1x128xf32>
    %62 = vector.broadcast %59 : vector<1x1xf32> to vector<1x128xf32>
    %63 = arith.mulf %62, %61 : vector<1x128xf32>
    %64 = vector.extract_strided_slice %10 {offsets = [4, 0], sizes = [1, 1], strides = [1, 1]} : vector<8x1xf32> to vector<1x1xf32>
    %65 = vector.extract_strided_slice %36 {offsets = [4, 0], sizes = [1, 128], strides = [1, 1]} : vector<32x128xf32> to vector<1x128xf32>
    %66 = math.exp %65 : vector<1x128xf32>
    %67 = vector.broadcast %64 : vector<1x1xf32> to vector<1x128xf32>
    %68 = arith.mulf %67, %66 : vector<1x128xf32>
    %69 = vector.extract_strided_slice %36 {offsets = [5, 0], sizes = [4, 128], strides = [1, 1]} : vector<32x128xf32> to vector<4x128xf32>
    %cst_20 = arith.constant dense<0xFF800000> : vector<128xf32>
    %70 = vector.multi_reduction <maximumf>, %69, %cst_20 [0] : vector<4x128xf32> to vector<128xf32>
    %71 = vector.shape_cast %70 : vector<128xf32> to vector<1x128xf32>
    %72 = tpu.iota {dimensions = array<i32: 0>} : vector<4x128xi32>
    %73 = vector.broadcast %71 : vector<1x128xf32> to vector<4x128xf32>
    %74 = arith.cmpf oge, %69, %73 : vector<4x128xf32>
    %c4_i32 = arith.constant 4 : i32
    %75 = vector.broadcast %c4_i32 : i32 to vector<4x128xi32>
    %76 = arith.select %74, %72, %75 : vector<4x128xi1>, vector<4x128xi32>
    %cst_21 = arith.constant dense<2147483647> : vector<128xi32>
    %77 = vector.multi_reduction <minsi>, %76, %cst_21 [0] : vector<4x128xi32> to vector<128xi32>
    %78 = vector.shape_cast %77 : vector<128xi32> to vector<1x128xi32>
    %79 = arith.sitofp %78 : vector<1x128xi32> to vector<1x128xf32>
    %c0_22 = arith.constant 0 : index
    %c0_23 = arith.constant 0 : index
    %c0_24 = arith.constant 0 : index
    %80 = vector.load %arg8[%c0_22, %c0_23, %c0_24] : memref<3x8x128xf32, #tpu.memory_space<vmem>>, vector<1x1x128xf32>
    %81 = vector.shape_cast %80 : vector<1x1x128xf32> to vector<1x128xf32>
    %82 = vector.shape_cast %39 : vector<1x128xf32> to vector<1x1x128xf32>
    tpu.vector_store %arg8[%c0_22, %c0_23, %c0_24], %82 {strides = array<i32>} : memref<3x8x128xf32, #tpu.memory_space<vmem>>, vector<1x1x128xf32>,
    %c0_25 = arith.constant 0 : index
    %c1 = arith.constant 1 : index
    %c0_26 = arith.constant 0 : index
    %83 = vector.load %arg8[%c0_25, %c1, %c0_26] : memref<3x8x128xf32, #tpu.memory_space<vmem>>, vector<1x1x128xf32>
    %84 = vector.shape_cast %83 : vector<1x1x128xf32> to vector<1x128xf32>
    %85 = vector.shape_cast %46 : vector<1x128xf32> to vector<1x1x128xf32>
    tpu.vector_store %arg8[%c0_25, %c1, %c0_26], %85 {strides = array<i32>} : memref<3x8x128xf32, #tpu.memory_space<vmem>>, vector<1x1x128xf32>,
    %c0_27 = arith.constant 0 : index
    %c2 = arith.constant 2 : index
    %c0_28 = arith.constant 0 : index
    %86 = vector.load %arg8[%c0_27, %c2, %c0_28] : memref<3x8x128xf32, #tpu.memory_space<vmem>>, vector<1x1x128xf32>
    %87 = vector.shape_cast %86 : vector<1x1x128xf32> to vector<1x128xf32>
    %88 = vector.shape_cast %54 : vector<1x128xf32> to vector<1x1x128xf32>
    tpu.vector_store %arg8[%c0_27, %c2, %c0_28], %88 {strides = array<i32>} : memref<3x8x128xf32, #tpu.memory_space<vmem>>, vector<1x1x128xf32>,
    %c0_29 = arith.constant 0 : index
    %c3 = arith.constant 3 : index
    %c0_30 = arith.constant 0 : index
    %89 = vector.load %arg8[%c0_29, %c3, %c0_30] : memref<3x8x128xf32, #tpu.memory_space<vmem>>, vector<1x1x128xf32>
    %90 = vector.shape_cast %89 : vector<1x1x128xf32> to vector<1x128xf32>
    %91 = vector.shape_cast %58 : vector<1x128xf32> to vector<1x1x128xf32>
    tpu.vector_store %arg8[%c0_29, %c3, %c0_30], %91 {strides = array<i32>} : memref<3x8x128xf32, #tpu.memory_space<vmem>>, vector<1x1x128xf32>,
    %c0_31 = arith.constant 0 : index
    %c4 = arith.constant 4 : index
    %c0_32 = arith.constant 0 : index
    %92 = vector.load %arg8[%c0_31, %c4, %c0_32] : memref<3x8x128xf32, #tpu.memory_space<vmem>>, vector<1x1x128xf32>
    %93 = vector.shape_cast %92 : vector<1x1x128xf32> to vector<1x128xf32>
    %94 = vector.shape_cast %63 : vector<1x128xf32> to vector<1x1x128xf32>
    tpu.vector_store %arg8[%c0_31, %c4, %c0_32], %94 {strides = array<i32>} : memref<3x8x128xf32, #tpu.memory_space<vmem>>, vector<1x1x128xf32>,
    %c0_33 = arith.constant 0 : index
    %c5 = arith.constant 5 : index
    %c0_34 = arith.constant 0 : index
    %95 = vector.load %arg8[%c0_33, %c5, %c0_34] : memref<3x8x128xf32, #tpu.memory_space<vmem>>, vector<1x1x128xf32>
    %96 = vector.shape_cast %95 : vector<1x1x128xf32> to vector<1x128xf32>
    %97 = vector.shape_cast %68 : vector<1x128xf32> to vector<1x1x128xf32>
    tpu.vector_store %arg8[%c0_33, %c5, %c0_34], %97 {strides = array<i32>} : memref<3x8x128xf32, #tpu.memory_space<vmem>>, vector<1x1x128xf32>,
    %c0_35 = arith.constant 0 : index
    %c6 = arith.constant 6 : index
    %c0_36 = arith.constant 0 : index
    %98 = vector.load %arg8[%c0_35, %c6, %c0_36] : memref<3x8x128xf32, #tpu.memory_space<vmem>>, vector<1x1x128xf32>
    %99 = vector.shape_cast %98 : vector<1x1x128xf32> to vector<1x128xf32>
    %100 = vector.shape_cast %79 : vector<1x128xf32> to vector<1x1x128xf32>
    tpu.vector_store %arg8[%c0_35, %c6, %c0_36], %100 {strides = array<i32>} : memref<3x8x128xf32, #tpu.memory_space<vmem>>, vector<1x1x128xf32>,
    %c0_37 = arith.constant 0 : index
    %c7 = arith.constant 7 : index
    %c0_38 = arith.constant 0 : index
    %101 = vector.load %arg8[%c0_37, %c7, %c0_38] : memref<3x8x128xf32, #tpu.memory_space<vmem>>, vector<1x1x128xf32>
    %102 = vector.shape_cast %101 : vector<1x1x128xf32> to vector<1x128xf32>
    %103 = vector.shape_cast %50 : vector<1x128xf32> to vector<1x1x128xf32>
    tpu.vector_store %arg8[%c0_37, %c7, %c0_38], %103 {strides = array<i32>} : memref<3x8x128xf32, #tpu.memory_space<vmem>>, vector<1x1x128xf32>,
    %104 = vector.extract_strided_slice %36 {offsets = [9, 0], sizes = [1, 128], strides = [1, 1]} : vector<32x128xf32> to vector<1x128xf32>
    %105 = arith.negf %104 : vector<1x128xf32>
    %106 = math.exp %105 : vector<1x128xf32>
    %cst_39 = arith.constant 1.000000e+00 : f32
    %107 = vector.broadcast %cst_39 : f32 to vector<1x128xf32>
    %108 = arith.addf %107, %106 : vector<1x128xf32>
    %109 = arith.divf %107, %108 : vector<1x128xf32>
    %cst_40 = arith.constant 4.500000e-01 : f32
    %110 = vector.broadcast %cst_40 : f32 to vector<1x128xf32>
    %111 = arith.cmpf ogt, %109, %110 : vector<1x128xf32>
    %112 = arith.extui %111 : vector<1x128xi1> to vector<1x128xi32>
    %113 = arith.sitofp %112 : vector<1x128xi32> to vector<1x128xf32>
    %114 = vector.extract_strided_slice %36 {offsets = [10, 0], sizes = [1, 128], strides = [1, 1]} : vector<32x128xf32> to vector<1x128xf32>
    %115 = arith.addf %37, %114 : vector<1x128xf32>
    %116 = vector.broadcast %40 : vector<1x1xf32> to vector<1x128xf32>
    %117 = arith.mulf %115, %116 : vector<1x128xf32>
    %118 = vector.extract_strided_slice %36 {offsets = [11, 0], sizes = [1, 128], strides = [1, 1]} : vector<32x128xf32> to vector<1x128xf32>
    %119 = arith.addf %38, %118 : vector<1x128xf32>
    %120 = vector.broadcast %40 : vector<1x1xf32> to vector<1x128xf32>
    %121 = arith.mulf %119, %120 : vector<1x128xf32>
    %122 = vector.extract_strided_slice %10 {offsets = [2, 0], sizes = [1, 1], strides = [1, 1]} : vector<8x1xf32> to vector<1x1xf32>
    %123 = vector.extract_strided_slice %36 {offsets = [12, 0], sizes = [1, 128], strides = [1, 1]} : vector<32x128xf32> to vector<1x128xf32>
    %124 = math.exp %123 : vector<1x128xf32>
    %125 = vector.broadcast %122 : vector<1x1xf32> to vector<1x128xf32>
    %126 = arith.mulf %125, %124 : vector<1x128xf32>
    %127 = vector.extract_strided_slice %10 {offsets = [5, 0], sizes = [1, 1], strides = [1, 1]} : vector<8x1xf32> to vector<1x1xf32>
    %128 = vector.extract_strided_slice %36 {offsets = [13, 0], sizes = [1, 128], strides = [1, 1]} : vector<32x128xf32> to vector<1x128xf32>
    %129 = math.exp %128 : vector<1x128xf32>
    %130 = vector.broadcast %127 : vector<1x1xf32> to vector<1x128xf32>
    %131 = arith.mulf %130, %129 : vector<1x128xf32>
    %132 = vector.extract_strided_slice %36 {offsets = [14, 0], sizes = [4, 128], strides = [1, 1]} : vector<32x128xf32> to vector<4x128xf32>
    %cst_41 = arith.constant dense<0xFF800000> : vector<128xf32>
    %133 = vector.multi_reduction <maximumf>, %132, %cst_41 [0] : vector<4x128xf32> to vector<128xf32>
    %134 = vector.shape_cast %133 : vector<128xf32> to vector<1x128xf32>
    %135 = tpu.iota {dimensions = array<i32: 0>} : vector<4x128xi32>
    %136 = vector.broadcast %134 : vector<1x128xf32> to vector<4x128xf32>
    %137 = arith.cmpf oge, %132, %136 : vector<4x128xf32>
    %c4_i32_42 = arith.constant 4 : i32
    %138 = vector.broadcast %c4_i32_42 : i32 to vector<4x128xi32>
    %139 = arith.select %137, %135, %138 : vector<4x128xi1>, vector<4x128xi32>
    %cst_43 = arith.constant dense<2147483647> : vector<128xi32>
    %140 = vector.multi_reduction <minsi>, %139, %cst_43 [0] : vector<4x128xi32> to vector<128xi32>
    %141 = vector.shape_cast %140 : vector<128xi32> to vector<1x128xi32>
    %142 = arith.sitofp %141 : vector<1x128xi32> to vector<1x128xf32>
    %c1_44 = arith.constant 1 : index
    %c0_45 = arith.constant 0 : index
    %c0_46 = arith.constant 0 : index
    %143 = vector.load %arg8[%c1_44, %c0_45, %c0_46] : memref<3x8x128xf32, #tpu.memory_space<vmem>>, vector<1x1x128xf32>
    %144 = vector.shape_cast %143 : vector<1x1x128xf32> to vector<1x128xf32>
    %145 = vector.shape_cast %39 : vector<1x128xf32> to vector<1x1x128xf32>
    tpu.vector_store %arg8[%c1_44, %c0_45, %c0_46], %145 {strides = array<i32>} : memref<3x8x128xf32, #tpu.memory_space<vmem>>, vector<1x1x128xf32>,
    %c1_47 = arith.constant 1 : index
    %c1_48 = arith.constant 1 : index
    %c0_49 = arith.constant 0 : index
    %146 = vector.load %arg8[%c1_47, %c1_48, %c0_49] : memref<3x8x128xf32, #tpu.memory_space<vmem>>, vector<1x1x128xf32>
    %147 = vector.shape_cast %146 : vector<1x1x128xf32> to vector<1x128xf32>
    %148 = vector.shape_cast %109 : vector<1x128xf32> to vector<1x1x128xf32>
    tpu.vector_store %arg8[%c1_47, %c1_48, %c0_49], %148 {strides = array<i32>} : memref<3x8x128xf32, #tpu.memory_space<vmem>>, vector<1x1x128xf32>,
    %c1_50 = arith.constant 1 : index
    %c2_51 = arith.constant 2 : index
    %c0_52 = arith.constant 0 : index
    %149 = vector.load %arg8[%c1_50, %c2_51, %c0_52] : memref<3x8x128xf32, #tpu.memory_space<vmem>>, vector<1x1x128xf32>
    %150 = vector.shape_cast %149 : vector<1x1x128xf32> to vector<1x128xf32>
    %151 = vector.shape_cast %117 : vector<1x128xf32> to vector<1x1x128xf32>
    tpu.vector_store %arg8[%c1_50, %c2_51, %c0_52], %151 {strides = array<i32>} : memref<3x8x128xf32, #tpu.memory_space<vmem>>, vector<1x1x128xf32>,
    %c1_53 = arith.constant 1 : index
    %c3_54 = arith.constant 3 : index
    %c0_55 = arith.constant 0 : index
    %152 = vector.load %arg8[%c1_53, %c3_54, %c0_55] : memref<3x8x128xf32, #tpu.memory_space<vmem>>, vector<1x1x128xf32>
    %153 = vector.shape_cast %152 : vector<1x1x128xf32> to vector<1x128xf32>
    %154 = vector.shape_cast %121 : vector<1x128xf32> to vector<1x1x128xf32>
    tpu.vector_store %arg8[%c1_53, %c3_54, %c0_55], %154 {strides = array<i32>} : memref<3x8x128xf32, #tpu.memory_space<vmem>>, vector<1x1x128xf32>,
    %c1_56 = arith.constant 1 : index
    %c4_57 = arith.constant 4 : index
    %c0_58 = arith.constant 0 : index
    %155 = vector.load %arg8[%c1_56, %c4_57, %c0_58] : memref<3x8x128xf32, #tpu.memory_space<vmem>>, vector<1x1x128xf32>
    %156 = vector.shape_cast %155 : vector<1x1x128xf32> to vector<1x128xf32>
    %157 = vector.shape_cast %126 : vector<1x128xf32> to vector<1x1x128xf32>
    tpu.vector_store %arg8[%c1_56, %c4_57, %c0_58], %157 {strides = array<i32>} : memref<3x8x128xf32, #tpu.memory_space<vmem>>, vector<1x1x128xf32>,
    %c1_59 = arith.constant 1 : index
    %c5_60 = arith.constant 5 : index
    %c0_61 = arith.constant 0 : index
    %158 = vector.load %arg8[%c1_59, %c5_60, %c0_61] : memref<3x8x128xf32, #tpu.memory_space<vmem>>, vector<1x1x128xf32>
    %159 = vector.shape_cast %158 : vector<1x1x128xf32> to vector<1x128xf32>
    %160 = vector.shape_cast %131 : vector<1x128xf32> to vector<1x1x128xf32>
    tpu.vector_store %arg8[%c1_59, %c5_60, %c0_61], %160 {strides = array<i32>} : memref<3x8x128xf32, #tpu.memory_space<vmem>>, vector<1x1x128xf32>,
    %c1_62 = arith.constant 1 : index
    %c6_63 = arith.constant 6 : index
    %c0_64 = arith.constant 0 : index
    %161 = vector.load %arg8[%c1_62, %c6_63, %c0_64] : memref<3x8x128xf32, #tpu.memory_space<vmem>>, vector<1x1x128xf32>
    %162 = vector.shape_cast %161 : vector<1x1x128xf32> to vector<1x128xf32>
    %163 = vector.shape_cast %142 : vector<1x128xf32> to vector<1x1x128xf32>
    tpu.vector_store %arg8[%c1_62, %c6_63, %c0_64], %163 {strides = array<i32>} : memref<3x8x128xf32, #tpu.memory_space<vmem>>, vector<1x1x128xf32>,
    %c1_65 = arith.constant 1 : index
    %c7_66 = arith.constant 7 : index
    %c0_67 = arith.constant 0 : index
    %164 = vector.load %arg8[%c1_65, %c7_66, %c0_67] : memref<3x8x128xf32, #tpu.memory_space<vmem>>, vector<1x1x128xf32>
    %165 = vector.shape_cast %164 : vector<1x1x128xf32> to vector<1x128xf32>
    %166 = vector.shape_cast %113 : vector<1x128xf32> to vector<1x1x128xf32>
    tpu.vector_store %arg8[%c1_65, %c7_66, %c0_67], %166 {strides = array<i32>} : memref<3x8x128xf32, #tpu.memory_space<vmem>>, vector<1x1x128xf32>,
    %167 = vector.extract_strided_slice %36 {offsets = [18, 0], sizes = [1, 128], strides = [1, 1]} : vector<32x128xf32> to vector<1x128xf32>
    %168 = arith.negf %167 : vector<1x128xf32>
    %169 = math.exp %168 : vector<1x128xf32>
    %cst_68 = arith.constant 1.000000e+00 : f32
    %170 = vector.broadcast %cst_68 : f32 to vector<1x128xf32>
    %171 = arith.addf %170, %169 : vector<1x128xf32>
    %172 = arith.divf %170, %171 : vector<1x128xf32>
    %cst_69 = arith.constant 4.500000e-01 : f32
    %173 = vector.broadcast %cst_69 : f32 to vector<1x128xf32>
    %174 = arith.cmpf ogt, %172, %173 : vector<1x128xf32>
    %175 = arith.extui %174 : vector<1x128xi1> to vector<1x128xi32>
    %176 = arith.sitofp %175 : vector<1x128xi32> to vector<1x128xf32>
    %177 = vector.extract_strided_slice %36 {offsets = [19, 0], sizes = [1, 128], strides = [1, 1]} : vector<32x128xf32> to vector<1x128xf32>
    %178 = arith.addf %37, %177 : vector<1x128xf32>
    %179 = vector.broadcast %40 : vector<1x1xf32> to vector<1x128xf32>
    %180 = arith.mulf %178, %179 : vector<1x128xf32>
    %181 = vector.extract_strided_slice %36 {offsets = [20, 0], sizes = [1, 128], strides = [1, 1]} : vector<32x128xf32> to vector<1x128xf32>
    %182 = arith.addf %38, %181 : vector<1x128xf32>
    %183 = vector.broadcast %40 : vector<1x1xf32> to vector<1x128xf32>
    %184 = arith.mulf %182, %183 : vector<1x128xf32>
    %185 = vector.extract_strided_slice %10 {offsets = [3, 0], sizes = [1, 1], strides = [1, 1]} : vector<8x1xf32> to vector<1x1xf32>
    %186 = vector.extract_strided_slice %36 {offsets = [21, 0], sizes = [1, 128], strides = [1, 1]} : vector<32x128xf32> to vector<1x128xf32>
    %187 = math.exp %186 : vector<1x128xf32>
    %188 = vector.broadcast %185 : vector<1x1xf32> to vector<1x128xf32>
    %189 = arith.mulf %188, %187 : vector<1x128xf32>
    %190 = vector.extract_strided_slice %10 {offsets = [6, 0], sizes = [1, 1], strides = [1, 1]} : vector<8x1xf32> to vector<1x1xf32>
    %191 = vector.extract_strided_slice %36 {offsets = [22, 0], sizes = [1, 128], strides = [1, 1]} : vector<32x128xf32> to vector<1x128xf32>
    %192 = math.exp %191 : vector<1x128xf32>
    %193 = vector.broadcast %190 : vector<1x1xf32> to vector<1x128xf32>
    %194 = arith.mulf %193, %192 : vector<1x128xf32>
    %195 = vector.extract_strided_slice %36 {offsets = [23, 0], sizes = [4, 128], strides = [1, 1]} : vector<32x128xf32> to vector<4x128xf32>
    %cst_70 = arith.constant dense<0xFF800000> : vector<128xf32>
    %196 = vector.multi_reduction <maximumf>, %195, %cst_70 [0] : vector<4x128xf32> to vector<128xf32>
    %197 = vector.shape_cast %196 : vector<128xf32> to vector<1x128xf32>
    %198 = tpu.iota {dimensions = array<i32: 0>} : vector<4x128xi32>
    %199 = vector.broadcast %197 : vector<1x128xf32> to vector<4x128xf32>
    %200 = arith.cmpf oge, %195, %199 : vector<4x128xf32>
    %c4_i32_71 = arith.constant 4 : i32
    %201 = vector.broadcast %c4_i32_71 : i32 to vector<4x128xi32>
    %202 = arith.select %200, %198, %201 : vector<4x128xi1>, vector<4x128xi32>
    %cst_72 = arith.constant dense<2147483647> : vector<128xi32>
    %203 = vector.multi_reduction <minsi>, %202, %cst_72 [0] : vector<4x128xi32> to vector<128xi32>
    %204 = vector.shape_cast %203 : vector<128xi32> to vector<1x128xi32>
    %205 = arith.sitofp %204 : vector<1x128xi32> to vector<1x128xf32>
    %c2_73 = arith.constant 2 : index
    %c0_74 = arith.constant 0 : index
    %c0_75 = arith.constant 0 : index
    %206 = vector.load %arg8[%c2_73, %c0_74, %c0_75] : memref<3x8x128xf32, #tpu.memory_space<vmem>>, vector<1x1x128xf32>
    %207 = vector.shape_cast %206 : vector<1x1x128xf32> to vector<1x128xf32>
    %208 = vector.shape_cast %39 : vector<1x128xf32> to vector<1x1x128xf32>
    tpu.vector_store %arg8[%c2_73, %c0_74, %c0_75], %208 {strides = array<i32>} : memref<3x8x128xf32, #tpu.memory_space<vmem>>, vector<1x1x128xf32>,
    %c2_76 = arith.constant 2 : index
    %c1_77 = arith.constant 1 : index
    %c0_78 = arith.constant 0 : index
    %209 = vector.load %arg8[%c2_76, %c1_77, %c0_78] : memref<3x8x128xf32, #tpu.memory_space<vmem>>, vector<1x1x128xf32>
    %210 = vector.shape_cast %209 : vector<1x1x128xf32> to vector<1x128xf32>
    %211 = vector.shape_cast %172 : vector<1x128xf32> to vector<1x1x128xf32>
    tpu.vector_store %arg8[%c2_76, %c1_77, %c0_78], %211 {strides = array<i32>} : memref<3x8x128xf32, #tpu.memory_space<vmem>>, vector<1x1x128xf32>,
    %c2_79 = arith.constant 2 : index
    %c2_80 = arith.constant 2 : index
    %c0_81 = arith.constant 0 : index
    %212 = vector.load %arg8[%c2_79, %c2_80, %c0_81] : memref<3x8x128xf32, #tpu.memory_space<vmem>>, vector<1x1x128xf32>
    %213 = vector.shape_cast %212 : vector<1x1x128xf32> to vector<1x128xf32>
    %214 = vector.shape_cast %180 : vector<1x128xf32> to vector<1x1x128xf32>
    tpu.vector_store %arg8[%c2_79, %c2_80, %c0_81], %214 {strides = array<i32>} : memref<3x8x128xf32, #tpu.memory_space<vmem>>, vector<1x1x128xf32>,
    %c2_82 = arith.constant 2 : index
    %c3_83 = arith.constant 3 : index
    %c0_84 = arith.constant 0 : index
    %215 = vector.load %arg8[%c2_82, %c3_83, %c0_84] : memref<3x8x128xf32, #tpu.memory_space<vmem>>, vector<1x1x128xf32>
    %216 = vector.shape_cast %215 : vector<1x1x128xf32> to vector<1x128xf32>
    %217 = vector.shape_cast %184 : vector<1x128xf32> to vector<1x1x128xf32>
    tpu.vector_store %arg8[%c2_82, %c3_83, %c0_84], %217 {strides = array<i32>} : memref<3x8x128xf32, #tpu.memory_space<vmem>>, vector<1x1x128xf32>,
    %c2_85 = arith.constant 2 : index
    %c4_86 = arith.constant 4 : index
    %c0_87 = arith.constant 0 : index
    %218 = vector.load %arg8[%c2_85, %c4_86, %c0_87] : memref<3x8x128xf32, #tpu.memory_space<vmem>>, vector<1x1x128xf32>
    %219 = vector.shape_cast %218 : vector<1x1x128xf32> to vector<1x128xf32>
    %220 = vector.shape_cast %189 : vector<1x128xf32> to vector<1x1x128xf32>
    tpu.vector_store %arg8[%c2_85, %c4_86, %c0_87], %220 {strides = array<i32>} : memref<3x8x128xf32, #tpu.memory_space<vmem>>, vector<1x1x128xf32>,
    %c2_88 = arith.constant 2 : index
    %c5_89 = arith.constant 5 : index
    %c0_90 = arith.constant 0 : index
    %221 = vector.load %arg8[%c2_88, %c5_89, %c0_90] : memref<3x8x128xf32, #tpu.memory_space<vmem>>, vector<1x1x128xf32>
    %222 = vector.shape_cast %221 : vector<1x1x128xf32> to vector<1x128xf32>
    %223 = vector.shape_cast %194 : vector<1x128xf32> to vector<1x1x128xf32>
    tpu.vector_store %arg8[%c2_88, %c5_89, %c0_90], %223 {strides = array<i32>} : memref<3x8x128xf32, #tpu.memory_space<vmem>>, vector<1x1x128xf32>,
    %c2_91 = arith.constant 2 : index
    %c6_92 = arith.constant 6 : index
    %c0_93 = arith.constant 0 : index
    %224 = vector.load %arg8[%c2_91, %c6_92, %c0_93] : memref<3x8x128xf32, #tpu.memory_space<vmem>>, vector<1x1x128xf32>
    %225 = vector.shape_cast %224 : vector<1x1x128xf32> to vector<1x128xf32>
    %226 = vector.shape_cast %205 : vector<1x128xf32> to vector<1x1x128xf32>
    tpu.vector_store %arg8[%c2_91, %c6_92, %c0_93], %226 {strides = array<i32>} : memref<3x8x128xf32, #tpu.memory_space<vmem>>, vector<1x1x128xf32>,
    %c2_94 = arith.constant 2 : index
    %c7_95 = arith.constant 7 : index
    %c0_96 = arith.constant 0 : index
    %227 = vector.load %arg8[%c2_94, %c7_95, %c0_96] : memref<3x8x128xf32, #tpu.memory_space<vmem>>, vector<1x1x128xf32>
    %228 = vector.shape_cast %227 : vector<1x1x128xf32> to vector<1x128xf32>
    %229 = vector.shape_cast %176 : vector<1x128xf32> to vector<1x1x128xf32>
    tpu.vector_store %arg8[%c2_94, %c7_95, %c0_96], %229 {strides = array<i32>} : memref<3x8x128xf32, #tpu.memory_space<vmem>>, vector<1x1x128xf32>,
    return
  }
  func.func @transform_0(%arg0: i32, %arg1: memref<3xi32, #tpu.memory_space<smem>>) -> (i32, i32) {
    %c0_i32 = arith.constant 0 : i32
    %c0_i32_0 = arith.constant 0 : i32
    return %c0_i32, %arg0 : i32, i32
  }
  func.func @transform_1(%arg0: i32, %arg1: memref<3xi32, #tpu.memory_space<smem>>) -> (i32, i32, i32) {
    %0 = arith.index_cast %arg0 : i32 to index
    %1 = memref.load %arg1[%0] : memref<3xi32, #tpu.memory_space<smem>>
    %c0_i32 = arith.constant 0 : i32
    %c0_i32_0 = arith.constant 0 : i32
    %c0_i32_1 = arith.constant 0 : i32
    return %1, %c0_i32, %c0_i32_0 : i32, i32, i32
  }
  func.func @transform_2(%arg0: i32, %arg1: memref<3xi32, #tpu.memory_space<smem>>) -> (i32, i32, i32) {
    %0 = arith.index_cast %arg0 : i32 to index
    %1 = memref.load %arg1[%0] : memref<3xi32, #tpu.memory_space<smem>>
    %c0_i32 = arith.constant 0 : i32
    %c0_i32_0 = arith.constant 0 : i32
    %c0_i32_1 = arith.constant 0 : i32
    return %1, %c0_i32, %c0_i32_0 : i32, i32, i32
  }
  func.func @transform_3(%arg0: i32, %arg1: memref<3xi32, #tpu.memory_space<smem>>) -> (i32, i32, i32) {
    %0 = arith.index_cast %arg0 : i32 to index
    %1 = memref.load %arg1[%0] : memref<3xi32, #tpu.memory_space<smem>>
    %c0_i32 = arith.constant 0 : i32
    %c0_i32_0 = arith.constant 0 : i32
    %c0_i32_1 = arith.constant 0 : i32
    return %1, %c0_i32, %c0_i32_0 : i32, i32, i32
  }
  func.func @transform_4(%arg0: i32, %arg1: memref<3xi32, #tpu.memory_space<smem>>) -> (i32, i32, i32) {
    %0 = arith.index_cast %arg0 : i32 to index
    %1 = memref.load %arg1[%0] : memref<3xi32, #tpu.memory_space<smem>>
    %c0_i32 = arith.constant 0 : i32
    %c0_i32_0 = arith.constant 0 : i32
    %c0_i32_1 = arith.constant 0 : i32
    return %1, %c0_i32, %c0_i32_0 : i32, i32, i32
  }
  func.func @transform_5(%arg0: i32, %arg1: memref<3xi32, #tpu.memory_space<smem>>) -> (i32, i32, i32) {
    %0 = arith.index_cast %arg0 : i32 to index
    %1 = memref.load %arg1[%0] : memref<3xi32, #tpu.memory_space<smem>>
    %c0_i32 = arith.constant 0 : i32
    %c0_i32_0 = arith.constant 0 : i32
    %c0_i32_1 = arith.constant 0 : i32
    return %1, %c0_i32, %c0_i32_0 : i32, i32, i32
  }
  func.func @transform_6(%arg0: i32, %arg1: memref<3xi32, #tpu.memory_space<smem>>) -> (i32, i32, i32) {
    %c0_i32 = arith.constant 0 : i32
    %c0_i32_0 = arith.constant 0 : i32
    %c0_i32_1 = arith.constant 0 : i32
    return %c0_i32, %c0_i32_0, %arg0 : i32, i32, i32
  }
}

</mosaic_0001>

<bundles_post_ra>
// kernel: detector_dense.1
= control target key start
LH: loop header
LB: loop body
LE: loop exit
PB: predicated region body
PF: predicated region fallthrough
CT: control target
= control target key end

     0   :  { %s1501_s0 = inlined_call_operand.vmem [shape: s32[3], index: 0, kind: input, shape index: {}]   ;;  %s1502_s1 = inlined_call_operand.vmem [shape: f32[8,384], index: 1, kind: input, shape index: {}]   ;;  %s1503_s2 = inlined_call_operand.vmem [shape: f32[3,32,3], index: 2, kind: input, shape index: {}]   ;;  %s1504_s3 = inlined_call_operand.vmem [shape: f32[3,32,1], index: 3, kind: input, shape index: {}]   ;;  %s1505_s4 = inlined_call_operand.vmem [shape: f32[3,32,32], index: 4, kind: input, shape index: {}]   ;;  %s1506_s5 = inlined_call_operand.vmem [shape: f32[3,32,1], index: 5, kind: input, shape index: {}]   ;;  %s1507_s6 = inlined_call_operand.vmem [shape: f32[3,8,1], index: 6, kind: input, shape index: {}]   ;;  %s1508_s7 = inlined_call_operand.hbm [shape: f32[3,8,384], index: 7, kind: output, shape index: {}]  }
   0x1   :  { %s12_s26 = sshll.u32 %s1501_s0, 4  ;;  %s13_s26 = int_to_ptr.vmem [resolvable:$true] %s12_s26 }
   0x2   :  { %s1118_s27 = scalar_lea.vmem %s13_s26, 16  ;;  %p1123_p1 = scmp.lt.s32.totalorder %s13_s26, %s13_s26 }
   0x3   :  { %p1119_p0 = scmp.ne.s32.totalorder %s13_s26, %s1118_s27  ;;  %p1124_p2 = scmp.lt.s32.totalorder %s1118_s27, %s1118_s27 }
   0x5   :  { %p1125_p3 = por %p1124_p2, %p1123_p1 }
   0x7   :  { %p1126_p4 = pnand %p1125_p3, %p1119_p0 }
   0x9   :  { %1129 = shalt.err (!%p1126_p4)  }
   0xa   :  { %s1194_s28 = smov [#allocation3]  }
   0xb   :  { %15 = dma.vmem_to_smem %s13_s26, 16, %s1194_s28, [#allocation2] }
   0xc   :  { %1172 = dma.done.wait [#allocation2], 16 }
   0xd   :  { %1173 = vsyncadd [#allocation2], 4294967280 }
   0xe   :  { %17 = sfence }
   0xf   :  { %18 = vsyncpa [#allocation5], 0 }
  0x10   :  { %20 = vsyncpa [#allocation5 + $0x1], 0  ;;  %s1246_s29 = smov 0   ;;  %s1248_s30 = smov 0  }
  0x11   :  { %s1250_s0 = smov 0   ;;  %s1252_s8 = smov 0  }
  0x12 LB: > { %s1267_s9 = sadd.s32 4294967295, %s1192_s8   ;;  %s963_s10 = sadd.s32 4294967294, %s1192_s8   ;;  %s1192_s8 = sphi %s1252_s8, %s1514_s8   ;;  %s1188_s0 = sphi %s1250_s0, %s1513_s0   ;;  %s1184_s30 = sphi %s1248_s30, %s1512_s30   ;;  %s1180_s29 = sphi %s1246_s29, %s1511_s29  }
  0x13   : > { %s1271_s11 = sadd.s32 1, %s1192_s8   ;;  %s199_s12 = sadd.s32 1, %s1188_s0 }
  0x14   : > { %s196_s13 = ssub.s32 %s1192_s8, %s1271_s11  ;;  %p209_p5 = scmp.ne.s32.totalorder %s1188_s0, %s1184_s30 }
  0x15   : > { %p197_p6 = scmp.eq.s32.totalorder %s196_s13, 0  ;;  %p210_p7 = scmp.eq.s32.totalorder %s1267_s9, 2 }
  0x16   : > { %p215_p8 = scmp.ne.s32.totalorder %s1184_s30, %s1180_s29  ;;  %p216_p9 = scmp.eq.s32.totalorder %s963_s10, 2 }
  0x17   : > { %s1282_s14 = scalar_select %p197_p6, %s1188_s0, %s199_s12  }
  0x18   : > { %p1284_p10 = por %p210_p7, %p209_p5  ;;  %p1288_p11 = por %p216_p9, %p215_p8 }
  0x19   : > { %p966_p12 = scmp.ge.s32.totalorder %s1192_s8, 1  ;;  %p290_p13 = scmp.lt.s32.totalorder %s1192_s8, 4 }
  0x1b   : > { %p291_p0 = pnand %p966_p12, %p290_p13 }
  0x1c   : > { %s352_s17 = sld [smem:[#allocation3 + %s1267_s9]] (!%p291_p0)  ;;  %p348_p1 = scmp.lt.s32.totalorder (!%p291_p0), %s1267_s9, 2 }
  0x1d   : > { %294 = sbr.rel (%p291_p0) target bundleno = 474 (0x1da), region = 44  ;;  %s359_s18 = sld [smem:[#allocation3 + %s1267_s9]] (!%p291_p0) }
  0x1e   : > { %s373_s25 = sld [smem:[#allocation3 + %s1267_s9]] (!%p291_p0)  ;;  %s345_s26 = sand.u32 (!%p291_p0), 1, %s1184_s30  }
  0x1f   : > { %s1040_s12 = smul.u32 (!%p291_p0), 24, %s345_s26 }
  0x21   : > { %s1316_s13 = scalar_lea.vmem (!%p291_p0), [#allocation4], %s1040_s12 }
  0x22   : > { %v1195_v0 = vmov 1   ;;  %v1196_v1 = vmov 0   ;;  %p353_p2 = scmp.lt.s32.totalorder %s352_s17, 2  ;;  %v1197_v5 = vmov 2   ;;  %vm540_vm0 = vcmask 261120   ;;  %s841_s27 = sshll.u32 %s1316_s13, 4  ;;  %s1456_s27 = int_to_ptr.vmem [resolvable:$true] %s841_s27 }
  0x23   : > { %1088 = vset.pattern.permute.xlu0 %v1195_v0  ;;  %1089 = vset.pattern.permute.xlu1 %v1196_v1  ;;  %s349_s19 = scalar_select %p348_p1, %s1267_s9, 2  ;;  %v424_v21 = vlaneseq  ;;  %vm731_vm1 = vcmask 1047558   ;;  %vm791_vm2 = vcmask 1042432   ;;  %vm669_vm3 = vcmask 1047557  }
  0x24   : > { %s1516_s17 = smov (!%p353_p2, %s352_s17), 2  ;;  %p360_p3 = scmp.lt.s32.totalorder %s359_s18, 2  ;;  %vm671_vm4 = vcmask 1040384   ;;  %vm733_vm5 = vcmask 1041408   ;;  %vm789_vm6 = vcmask 1047559  }
  0x25   : > { %s1006_s20 = sshll.u32 %s1516_s17, 5  ;;  %s967_s24 = sshll.u32 %s349_s19, 3  ;;  %v1360_v24 = vshrl.u32 %v424_v21, 7 }
  0x26   : > { %s1302_s23 = scalar_lea.vmem %s1503_s2, %s1006_s20  ;;  %s351_s10 = scalar_lea.vmem %s1502_s1, %s967_s24 }
  0x27   : > { %v390_v2 = vld [vmem:[%s1302_s23 + $0x18] sm:$0xff]  ;;  %v389_v3 = vld [vmem:[%s1302_s23 + $0x10] sm:$0xff]  ;;  %v388_v4 = vld [vmem:[%s1302_s23 + $0x8] sm:$0xff]  ;;  %s1518_s18 = smov (!%p360_p3, %s359_s18), 2  ;;  %p374_p4 = scmp.lt.s32.totalorder %s373_s25, 2  ;;  %v450_v27 = vsub.s32 1, %v1360_v24 }
  0x28   : > { %445 = vperm.xlu0 %1088, %v390_v2   ;;  %416 = vperm.xlu1 %1089, %v389_v3   ;;  %v1314_v6 = vld [vmem:[%s351_s10] sm:$0xff]  ;;  %s380_s17 = sld [smem:[#allocation3 + %s1267_s9]]  ;;  %s1007_s19 = sshll.u32 %s1518_s18, 5  ;;  %v426_v28 = vsub.s32 0, %v1360_v24  ;;  %v478_v30 = vsub.s32 2, %v1360_v24 }
  0x29   : > { %701 = vst [vmem:[%s1316_s13 - $0x5] sm:$0x20] %v1314_v6  ;;  %985 = vst [vmem:[%s1316_s13 + $0x3] sm:$0x20] %v1314_v6  ;;  %s1520_s25 = smov (!%p374_p4, %s373_s25), 2  ;;  %v387_v7 = vld [vmem:[%s1302_s23] sm:$0xff]  ;;  %s1330_s22 = scalar_lea.vmem %s1504_s3, %s1007_s19  ;;  %v451_v29 = vrot.slane %v1314_v6, %v450_v27 }
  0x2a   : > { %995 = vst [vmem:[%s1316_s13 + $0xb] sm:$0x20] %v1314_v6  ;;  %s1009_s24 = sshll.u32 %s1520_s25, 5  ;;  %v393_v8 = vld [vmem:[%s1330_s22 + $0x10] sm:$0xff]  ;;  %v394_v11 = vld [vmem:[%s1330_s22 + $0x18] sm:$0xff]  ;;  %s366_s19 = sld [smem:[#allocation3 + %s1267_s9]]  ;;  %v427_v33 = vrot.slane %v1314_v6, %v426_v28  ;;  %v479_v35 = vrot.slane %v1314_v6, %v478_v30 }
  0x2b   : > { %s1336_s28 = scalar_lea.vmem %s1506_s5, %s1009_s24  ;;  %v392_v13 = vld [vmem:[%s1330_s22 + $0x8] sm:$0xff]  ;;  %v391_v14 = vld [vmem:[%s1330_s22] sm:$0xff]  ;;  %s1003_s22 = sshll.u32 %s1267_s9, 7 }
  0x2c   : > { %1095 = vset.pattern.permute.xlu0 %v1197_v5  ;;  %1090 = vset.pattern.permute.xlu1 %v1195_v0  ;;  %v399_v9 = vld [vmem:[%s1336_s28] sm:$0xff]  ;;  %v401_v10 = vld [vmem:[%s1336_s28 + $0x10] sm:$0xff]  ;;  %v400_v15 = vld [vmem:[%s1336_s28 + $0x8] sm:$0xff]  ;;  %s1461_s25 = scalar_lea.sflag [#allocation5], %s345_s26  ;;  %s1130_s9 = scalar_lea.vmem %s1456_s27, 384 }
  0x2d   : > { %441 = vperm.xlu1 %1090, %v389_v3   ;;  %465 = vperm.xlu0 %1095, %v388_v4   ;;  %v402_v18 = vld [vmem:[%s1336_s28 + $0x18] sm:$0xff]  ;;  %p1131_p7 = scmp.ne.s32.totalorder %s1456_s27, %s1130_s9  ;;  %s1199_s10 = smov [#allocation4]  }
  0x2e   : > { %p381_p5 = scmp.lt.s32.totalorder %s380_s17, 2 }
  0x2f   : > { %p1132_p8 = pnand %p1131_p7, %p1284_p10 }
  0x30   : > { %s1522_s17 = smov (!%p381_p5, %s380_s17), 2  ;;  %p367_p6 = scmp.lt.s32.totalorder %s366_s19, 2 }
  0x31   : > { %1091 = vset.pattern.permute.xlu1 %v1197_v5  ;;  %1096 = vset.pattern.permute.xlu0 %v1196_v1  ;;  %s976_s23 = sshll.u32 %s1522_s17, 3  ;;  %p1133_p9 = pneg %p1132_p8 }
  0x32   : > { %473 = vperm.xlu1 %1091, %v390_v2   ;;  %421 = vperm.xlu0 %1096, %v390_v2   ;;  %s384_s12 = scalar_lea.vmem %s1507_s6, %s976_s23  ;;  %s1524_s19 = smov (!%p367_p6, %s366_s19), 2 }
  0x33   : > { %v403_v12 = vld [vmem:[%s384_s12] sm:$0xff]  ;;  %s1008_s17 = sshll.u32 %s1524_s19, 5  ;;  %s1454_s23 = scalar_lea.hbm %s1508_s7, %s1003_s22 }
  0x34   : > { %s1353_s24 = scalar_lea.vmem %s1505_s4, %s1008_s17  ;;  %s1134_s12 = sshll.u32 %s1199_s10, 4  ;;  %s1135_s12 = int_to_ptr.vmem [resolvable:$false] %s1134_s12 }
  0x35   : > { %v395_v16 = vld [vmem:[%s1353_s24] sm:$0xff]  ;;  %v397_v17 = vld [vmem:[%s1353_s24 + $0x10] sm:$0xff]  ;;  %s1136_s19 = scalar_lea.vmem %s1135_s12, 768  ;;  %p1137_p12 = scmp.lt.s32.totalorder %s1456_s27, %s1135_s12 }
  0x36   : > { %1092 = vset.pattern.permute.xlu1 %v1195_v0  ;;  %411 = vperm.xlu0 %1096, %v388_v4   ;;  %p1138_p13 = scmp.lt.s32.totalorder %s1136_s19, %s1130_s9 }
  0x37   : > { %437 = vperm.xlu1 %1092, %v388_v4   ;;  %1026 = vmatprep.mubr.msk.f32.mxu0 %vm540_vm0, %v395_v16 }
  0x38   : > { %1029 = vmatprep.mubr.msk.f32.mxu1 %vm540_vm0, %v397_v17  ;;  %p1139_p0 = por %p1138_p13, %p1137_p12 }
  0x3a   : > { %406 = vperm.xlu0 %1096, %v387_v7   ;;  %p1140_p1 = pnand %p1139_p0, %p1133_p9 }
  0x3b   : > { %1093 = vset.pattern.permute.xlu1 %v1197_v5 }
  0x3c   : > { %469 = vperm.xlu1 %1093, %v389_v3  }
  0x3e   : > { %500 = vperm.xlu0 %1096, %v393_v8  }
  0x40   : > { %1094 = vset.pattern.permute.xlu1 %v1195_v0 }
  0x41   : > { %433 = vperm.xlu1 %1094, %v387_v7  }
  0x42   : > { %522 = vperm.xlu0 %1096, %v399_v9  }
  0x45   : > { %1097 = vset.pattern.permute.xlu1 %v1196_v1 }
  0x46   : > { %532 = vperm.xlu0 %1096, %v401_v10   ;;  %505 = vperm.xlu1 %1097, %v394_v11  }
  0x4a   : > { %653 = vperm.xlu0 %1096, %v403_v12   ;;  %1098 = vset.pattern.permute.xlu1 %v1197_v5  ;;  %v396_v12 = vld [vmem:[%s1353_s24 + $0x8] sm:$0xff] }
  0x4b   : > { %461 = vperm.xlu1 %1098, %v387_v7  }
  0x4f   : > { %1099 = vset.pattern.permute.xlu1 %v1196_v1 }
  0x50   : > { %495 = vperm.xlu1 %1099, %v392_v13   ;;  %v398_v13 = vld [vmem:[%s1353_s24 + $0x18] sm:$0xff] }
  0x54   : > { %490 = vperm.xlu1 %1099, %v391_v14  }
  0x58   : > { %527 = vperm.xlu1 %1099, %v400_v15  }
  0x5c   : > { %537 = vperm.xlu1 %1099, %v402_v18  }
  0xa3   : > { %v417_v19 = vpop.permute.xlu1 %416  ;;  %v446_v20 = vpop.permute.xlu0 %445 }
  0xa4   : > { %v430_v37 = vmul.f32 %v427_v33, %v417_v19  ;;  %v455_v38 = vmul.f32 %v451_v29, %v446_v20 }
  0xa8   : > { %v442_v22 = vpop.permute.xlu1 %441  ;;  %v466_v23 = vpop.permute.xlu0 %465 }
  0xa9   : > { %v454_v34 = vmul.f32 %v451_v29, %v442_v22  ;;  %v481_v56 = vmul.f32 %v479_v35, %v466_v23 }
  0xab   : > { %v458_v42 = vadd.f32 %v454_v34, %v430_v37 }
  0xad   : > { %v474_v25 = vpop.permute.xlu1 %473  ;;  %v422_v26 = vpop.permute.xlu0 %421 }
  0xae   : > { %v431_v39 = vmul.f32 %v427_v33, %v422_v26  ;;  %v483_v46 = vmul.f32 %v479_v35, %v474_v25 }
  0xb0   : > { %v459_v43 = vadd.f32 %v455_v38, %v431_v39 }
  0xb1   : > { %v412_v32 = vpop.permute.xlu0 %411 }
  0xb2   : > { %v438_v31 = vpop.permute.xlu1 %437  ;;  %v487_v49 = vadd.f32 %v483_v46, %v459_v43  ;;  %v429_v51 = vmul.f32 %v427_v33, %v412_v32 }
  0xb3   : > { %v453_v52 = vmul.f32 %v451_v29, %v438_v31 }
  0xb5   : > { %v407_v41 = vpop.permute.xlu0 %406  ;;  %v457_v57 = vadd.f32 %v453_v52, %v429_v51 }
  0xb6   : > { %v428_v60 = vmul.f32 %v427_v33, %v407_v41 }
  0xb7   : > { %v470_v36 = vpop.permute.xlu1 %469  ;;  %v485_v0 = vadd.f32 %v481_v56, %v457_v57 }
  0xb8   : > { %v482_v40 = vmul.f32 %v479_v35, %v470_v36 }
  0xb9   : > { %v501_v47 = vpop.permute.xlu0 %500 }
  0xba   : > { %v486_v44 = vadd.f32 %v482_v40, %v458_v42 }
  0xbc   : > { %v434_v45 = vpop.permute.xlu1 %433  ;;  %v510_v48 = vadd.f32 %v501_v47, %v486_v44 }
  0xbd   : > { %v452_v62 = vmul.f32 %v451_v29, %v434_v45  ;;  %v523_v14 = vpop.permute.xlu0 %522 }
  0xbe   : > { %v514_v54 = vmax.f32 %v510_v48, 0.0 }
  0xbf   : > { %v456_v2 = vadd.f32 %v452_v62, %v428_v60 }
  0xc0   : > { %v518_v61 = vmin.f32 %v514_v54, 6.0 }
  0xc1   : > { %v506_v50 = vpop.permute.xlu1 %505  ;;  %v533_v15 = vpop.permute.xlu0 %532 }
  0xc2   : > { %v511_v53 = vadd.f32 %v506_v50, %v487_v49 }
  0xc4   : > { %v515_v55 = vmax.f32 %v511_v53, 0.0 }
  0xc5   : > { %v1372_v17 = vpop.permute.xlu0 %653 }
  0xc6   : > { %v519_v58 = vmin.f32 %v515_v55, 6.0  ;;  %v462_v59 = vpop.permute.xlu1 %461  ;;  %v655_v21 = vrot.slane %v1372_v17, 5  ;;  %v658_v25 = vrot.slane %v1372_v17, 4 }
  0xc7   : > { %v480_v63 = vmul.f32 %v479_v35, %v462_v59 }
  0xc8   : > { %1018 = vmatprep.subr.mxu0 %v519_v58  ;;  %1032 = vmatprep.subr.mxu1 %v519_v58 }
  0xc9   : > { %1019 = vmatpush3.msra.mxu0 %v519_v58  ;;  %1036 = vmatpush3.msra.mxu1 %v519_v58  ;;  %v484_v5 = vadd.f32 %v480_v63, %v456_v2 }
  0xca   : > { %1020 = vmatprep.subr.mxu0 %v518_v61  ;;  %1033 = vmatprep.subr.mxu1 %v518_v61 }
  0xcb   : > { %v496_v1 = vpop.permute.xlu1 %495  ;;  %1021 = vmatpush3.msra.mxu0 %v518_v61  ;;  %1037 = vmatpush3.msra.mxu1 %v518_v61 }
  0xcc   : > { %v509_v3 = vadd.f32 %v496_v1, %v485_v0 }
  0xce   : > { %v513_v4 = vmax.f32 %v509_v3, 0.0 }
  0xcf   : > { %v491_v7 = vpop.permute.xlu1 %490 }
  0xd0   : > { %v517_v8 = vmin.f32 %v513_v4, 6.0  ;;  %v508_v9 = vadd.f32 %v491_v7, %v484_v5 }
  0xd2   : > { %v512_v10 = vmax.f32 %v508_v9, 0.0  ;;  %1022 = vmatprep.subr.mxu0 %v517_v8  ;;  %1034 = vmatprep.subr.mxu1 %v517_v8 }
  0xd3   : > { %1023 = vmatpush3.msra.mxu0 %v517_v8  ;;  %1038 = vmatpush3.msra.mxu1 %v517_v8  ;;  %v528_v16 = vpop.permute.xlu1 %527  ;;  %v684_v8 = vrot.slane %v1360_v24, 3 }
  0xd4   : > { %v516_v11 = vmin.f32 %v512_v10, 6.0 }
  0xd6   : > { %1024 = vmatprep.subr.mxu0 %v516_v11  ;;  %1035 = vmatprep.subr.mxu1 %v516_v11 }
  0xd7   : > { %1025 = vmatpush3.msra.mxu0 %v516_v11  ;;  %1039 = vmatpush3.msra.mxu1 %v516_v11  ;;  %v538_v18 = vpop.permute.xlu1 %537 }
  0xd8   : > { %1027 = vmatmul.mubr.msk.f32.vlgmr.msra.gmra.mxu0 %vm540_vm0, %v396_v12  ;;  %1030 = vmatmul.mubr.msk.f32.vlgmr.msra.gmra.mxu1 %vm540_vm0, %v398_v13 }
 0x198   : > { %v1028_v19 = vpop.f32.mrf.mxu0  ;;  %v1031_v20 = vpop.f32.mrf.mxu1 }
 0x199   : > { %v1375_v22 = vadd.f32 %v1028_v19, %v528_v16  ;;  %v1377_v23 = vadd.f32 %v1031_v20, %v538_v18 }
 0x19a   : > { %v619_v26 = vpop.f32.mrf.mxu0  ;;  %v629_v27 = vpop.f32.mrf.mxu1 }
 0x19b   : > { %v983_v28 = vmul.f32 -1.442695, %v1375_v22  ;;  %v719_v29 = vrot.slane %v1375_v22, 7  ;;  %v724_v30 = vmul.f32 1.442695, %v1375_v22  ;;  %v732_v31 = vsel %vm731_vm1, %v1375_v22, -inf }
 0x19c   : > { %v1385_v32 = vadd.f32 %v619_v26, %v523_v14  ;;  %v1387_v33 = vadd.f32 %v629_v27, %v533_v15  ;;  %v792_v35 = vsel %vm791_vm2, %v1377_v23, -inf  ;;  %v672_v36 = vsel %vm671_vm4, %v1375_v22, -inf }
 0x19d   : > { %1100 = vpow2.f32 %v983_v28  ;;  %v721_v34 = vadd.f32 %v719_v29, %v1314_v6  ;;  %v744_v14 = vrot.slane %v1360_v24, 2 }
 0x19e   : > { %1102 = vpow2.f32 %v724_v30  ;;  %v981_v37 = vmul.f32 -1.442695, %v1385_v32  ;;  %v648_v38 = vrot.slane %v1385_v32, 6  ;;  %v661_v39 = vmul.f32 1.442695, %v1385_v32 }
 0x19f   : > { %v722_v40 = vmul.f32 %v721_v34, %v655_v21  ;;  %v723_v41 = vmul.f32 %v721_v34, %v658_v25  ;;  %v670_v42 = vsel %vm669_vm3, %v1385_v32, -inf  ;;  %v734_v43 = vsel %vm733_vm5, %v1387_v33, -inf }
 0x1a0   : > { %1104 = vpow2.f32 %v981_v37  ;;  %v650_v44 = vadd.f32 %v648_v38, %v1314_v6  ;;  %v673_v45 = vmax.f32 %v670_v42, %v672_v36  ;;  %v735_v46 = vmax.f32 %v732_v31, %v734_v43 }
 0x1a1   : > { %987 = vst [vmem:[%s1316_s13 + $0x7] sm:$0x8] %v722_v40  ;;  %988 = vst [vmem:[%s1316_s13 + $0x7] sm:$0x10] %v723_v41  ;;  %1106 = vpow2.f32 %v661_v39  ;;  %v993_v47 = vmul.f32 -1.442695, %v1387_v33  ;;  %v779_v48 = vadd.f32 %v1387_v33, %v1314_v6 }
 0x1a2   : > { %v782_v49 = vmul.f32 1.442695, %v1387_v33  ;;  %v657_v50 = vmul.f32 %v655_v21, %v650_v44  ;;  %v660_v51 = vmul.f32 %v658_v25, %v650_v44  ;;  %v674_v52 = vrot.slane %v673_v45, 4 }
 0x1a3   : > { %v736_v53 = vrot.slane %v735_v46, 4  ;;  %1108 = vpow2.f32 %v993_v47  ;;  %v780_v54 = vmul.f32 %v779_v48, %v655_v21  ;;  %v781_v55 = vmul.f32 %v779_v48, %v658_v25 }
 0x1a4   : > { %v790_v56 = vsel %vm789_vm6, %v1387_v33, -inf  ;;  %v675_v57 = vmax.f32 %v673_v45, %v674_v52  ;;  %703 = vst [vmem:[%s1316_s13 - $0x1] sm:$0x8] %v657_v50  ;;  %704 = vst [vmem:[%s1316_s13 - $0x1] sm:$0x10] %v660_v51  ;;  %1110 = vpow2.f32 %v782_v49  ;;  %v802_v44 = vrot.slane %v1360_v24, 1 }
 0x1a5   : > { %v737_v58 = vmax.f32 %v735_v46, %v736_v53  ;;  %v793_v6 = vmax.f32 %v790_v56, %v792_v35  ;;  %997 = vst [vmem:[%s1316_s13 + $0xf] sm:$0x8] %v780_v54  ;;  %998 = vst [vmem:[%s1316_s13 + $0xf] sm:$0x10] %v781_v55 }
 0x1a6   : > { %v676_v59 = vrot.slane %v675_v57, 2 }
 0x1a7   : > { %v738_v60 = vrot.slane %v737_v58, 2  ;;  %v794_v61 = vrot.slane %v793_v6, 4 }
 0x1a8   : > { %v677_v62 = vmax.f32 %v675_v57, %v676_v59 }
 0x1a9   : > { %v739_v63 = vmax.f32 %v737_v58, %v738_v60  ;;  %v795_v0 = vmax.f32 %v793_v6, %v794_v61 }
 0x1aa   : > { %v1101_v1 = vpop.eup %1100  ;;  %v678_v2 = vrot.slane %v677_v62, 1 }
 0x1ab   : > { %v740_v3 = vrot.slane %v739_v63, 1  ;;  %v796_v4 = vrot.slane %v795_v0, 2  ;;  %v1103_v5 = vpop.eup %1102  ;;  %v712_v7 = vadd.f32 1.0, %v1101_v1 }
 0x1ac   : > { %v727_v9 = vrot.slane %v1103_v5, 2  ;;  %v730_v10 = vmul.f32 %v1103_v5, %v1372_v17  ;;  %v679_v11 = vmax.f32 %v677_v62, %v678_v2 }
 0x1ad   : > { %v741_v12 = vmax.f32 %v739_v63, %v740_v3  ;;  %v1105_v13 = vpop.eup %1104  ;;  %1112 = vrcp.f32 %v712_v7  ;;  %v797_v15 = vmax.f32 %v795_v0, %v796_v4 }
 0x1ae   : > { %v1107_v16 = vpop.eup %1106  ;;  %v729_v18 = vmul.f32 %v727_v9, %v1372_v17  ;;  %990 = vst [vmem:[%s1316_s13 + $0x8] sm:$0x20] %v730_v10  ;;  %v641_v19 = vadd.f32 1.0, %v1105_v13  ;;  %vm682_vm7 = vcmp.ge.f32.partialorder %v1385_v32, %v679_v11  ;;  %vm683_vm8 = vcmp.ge.f32.partialorder %v1375_v22, %v679_v11 }
 0x1af   : > { %v665_v20 = vrot.slane %v1107_v16, 2  ;;  %v668_v21 = vmul.f32 %v1107_v16, %v1372_v17  ;;  %v685_v25 = vsel %vm682_vm7, %v684_v8, 4  ;;  %v686_v26 = vsel %vm683_vm8, %v684_v8, 4 }
 0x1b0   : > { %v1109_v27 = vpop.eup %1108  ;;  %989 = vst [vmem:[%s1316_s13 + $0xa] sm:$0x4] %v729_v18  ;;  %1114 = vrcp.f32 %v641_v19  ;;  %v687_v28 = vsel %vm669_vm3, %v685_v25, 2147483647  ;;  %v688_v29 = vsel %vm671_vm4, %v686_v26, 2147483647  ;;  %vm742_vm9 = vcmp.ge.f32.partialorder %v1375_v22, %v741_v12 }
 0x1b1   : > { %v1111_v30 = vpop.eup %1110  ;;  %v667_v31 = vmul.f32 %v665_v20, %v1372_v17  ;;  %vm689_vm10 = vcmp.lt.s32.totalorder %v687_v28, %v688_v29  ;;  %706 = vst [vmem:[%s1316_s13 + $0x1] sm:$0x10] %v668_v21  ;;  %vm743_vm11 = vcmp.ge.f32.partialorder %v1387_v33, %v741_v12  ;;  %v745_v32 = vsel %vm742_vm9, %v744_v14, 4 }
 0x1b2   : > { %v690_v34 = vsel %vm689_vm10, %v687_v28, %v688_v29  ;;  %v746_v35 = vsel %vm743_vm11, %v744_v14, 4  ;;  %v747_v36 = vsel %vm731_vm1, %v745_v32, 2147483647  ;;  %v773_v37 = vadd.f32 1.0, %v1109_v27 }
 0x1b3   : > { %v691_v38 = vrot.slane %v690_v34, 4  ;;  %705 = vst [vmem:[%s1316_s13 + $0x3] sm:$0x2] %v667_v31  ;;  %v748_v39 = vsel %vm733_vm5, %v746_v35, 2147483647  ;;  %v785_v22 = vrot.slane %v1111_v30, 2  ;;  %v788_v40 = vmul.f32 %v1111_v30, %v1372_v17 }
 0x1b4   : > { %vm749_vm12 = vcmp.lt.s32.totalorder %v747_v36, %v748_v39  ;;  %1116 = vrcp.f32 %v773_v37  ;;  %v798_v41 = vrot.slane %v797_v15, 1 }
 0x1b5   : > { %vm692_vm13 = vcmp.lt.s32.totalorder %v690_v34, %v691_v38  ;;  %v750_v42 = vsel %vm749_vm12, %v747_v36, %v748_v39  ;;  %v787_v43 = vmul.f32 %v785_v22, %v1372_v17  ;;  %1000 = vst [vmem:[%s1316_s13 + $0xf] sm:$0x40] %v788_v40 }
 0x1b6   : > { %v693_v45 = vsel %vm692_vm13, %v690_v34, %v691_v38  ;;  %v751_v46 = vrot.slane %v750_v42, 4  ;;  %v799_v47 = vmax.f32 %v797_v15, %v798_v41 }
 0x1b7   : > { %v694_v48 = vrot.slane %v693_v45, 2  ;;  %999 = vst [vmem:[%s1316_s13 + $0x11] sm:$0x8] %v787_v43 }
 0x1b8   : > { %vm752_vm14 = vcmp.lt.s32.totalorder %v750_v42, %v751_v46  ;;  %vm800_vm15 = vcmp.ge.f32.partialorder %v1387_v33, %v799_v47  ;;  %vm801_vm0 = vcmp.ge.f32.partialorder %v1377_v23, %v799_v47  ;;  %v1198_v33 = vmov 0.0  }
 0x1b9   : > { %vm695_vm1 = vcmp.lt.s32.totalorder %v693_v45, %v694_v48  ;;  %v753_v49 = vsel %vm752_vm14, %v750_v42, %v751_v46  ;;  %v803_v50 = vsel %vm800_vm15, %v802_v44, 4  ;;  %v804_v51 = vsel %vm801_vm0, %v802_v44, 4 }
 0x1ba   : > { %v1113_v17 = vpop.eup %1112  ;;  %v696_v52 = vsel %vm695_vm1, %v693_v45, %v694_v48  ;;  %v754_v24 = vrot.slane %v753_v49, 2  ;;  %v805_v53 = vsel %vm789_vm6, %v803_v50, 2147483647  ;;  %v806_v54 = vsel %vm791_vm2, %v804_v51, 2147483647 }
 0x1bb   : > { %986 = vst [vmem:[%s1316_s13 + $0x8] sm:$0x2] %v1113_v17  ;;  %v697_v55 = vrot.slane %v696_v52, 1  ;;  %vm715_vm3 = vcmp.gt.f32.partialorder %v1113_v17, 0.45  ;;  %vm807_vm4 = vcmp.lt.s32.totalorder %v805_v53, %v806_v54 }
 0x1bc   : > { %v984_v23 = vsel %vm715_vm3, 1.0, %v1198_v33  ;;  %vm755_vm5 = vcmp.lt.s32.totalorder %v753_v49, %v754_v24  ;;  %v808_v56 = vsel %vm807_vm4, %v805_v53, %v806_v54 }
 0x1bd   : > { %v1115_v57 = vpop.eup %1114  ;;  %vm698_vm7 = vcmp.lt.s32.totalorder %v696_v52, %v697_v55  ;;  %992 = vst [vmem:[%s1316_s13 + $0xe] sm:$0x2] %v984_v23  ;;  %v756_v58 = vsel %vm755_vm5, %v753_v49, %v754_v24  ;;  %v809_v6 = vrot.slane %v808_v56, 4 }
 0x1be   : > { %vm644_vm8 = vcmp.gt.f32.partialorder %v1115_v57, 0.45  ;;  %v699_v59 = vsel %vm698_vm7, %v696_v52, %v697_v55  ;;  %702 = vst [vmem:[%s1316_s13 + $0x1] sm:$0x1] %v1115_v57  ;;  %v757_v60 = vrot.slane %v756_v58, 1 }
 0x1bf   : > { %v982_v61 = vsel %vm644_vm8, 1.0, %v1198_v33  ;;  %v700_v62 = vcvt.s32.f32 %v699_v59  ;;  %vm810_vm2 = vcmp.lt.s32.totalorder %v808_v56, %v809_v6 }
 0x1c0   : > { %708 = vst [vmem:[%s1316_s13 + $0x7] sm:$0x1] %v982_v61  ;;  %vm758_vm6 = vcmp.lt.s32.totalorder %v756_v58, %v757_v60  ;;  %v811_v63 = vsel %vm810_vm2, %v808_v56, %v809_v6 }
 0x1c1   : > { %v1117_v0 = vpop.eup %1116  ;;  %707 = vst [vmem:[%s1316_s13 + $0x6] sm:$0x1] %v700_v62  ;;  %v759_v1 = vsel %vm758_vm6, %v756_v58, %v757_v60  ;;  %v812_v2 = vrot.slane %v811_v63, 2 }
 0x1c2   : > { %v760_v3 = vcvt.s32.f32 %v759_v1  ;;  %vm776_vm9 = vcmp.gt.f32.partialorder %v1117_v0, 0.45  ;;  %996 = vst [vmem:[%s1316_s13 + $0xf] sm:$0x4] %v1117_v0 }
 0x1c3   : > { %v994_v4 = vsel %vm776_vm9, 1.0, %v1198_v33  ;;  %vm813_vm10 = vcmp.lt.s32.totalorder %v811_v63, %v812_v2 }
 0x1c4   : > { %991 = vst [vmem:[%s1316_s13 + $0xe] sm:$0x1] %v760_v3  ;;  %v814_v5 = vsel %vm813_vm10, %v811_v63, %v812_v2  ;;  %1002 = vst [vmem:[%s1316_s13 + $0x15] sm:$0x4] %v994_v4 }
 0x1c5   : > { %v815_v7 = vrot.slane %v814_v5, 1 }
 0x1c7   : > { %vm816_vm11 = vcmp.lt.s32.totalorder %v814_v5, %v815_v7 }
 0x1c8   : > { %v817_v8 = vsel %vm816_vm11, %v814_v5, %v815_v7 }
 0x1c9   : > { %v818_v9 = vcvt.s32.f32 %v817_v8 }
 0x1cb   : > { %1001 = vst [vmem:[%s1316_s13 + $0x16] sm:$0x1] %v818_v9 }
 0x1cc   : > { %1143 = shalt.err (!%p1140_p1)
}
 0x1cd   : > { %s1144_s26 = scalar_lea.hbm %s1454_s23, 384  ;;  %s1148_s20 = scalar_lea.hbm %s1508_s7, 1152 }
 0x1ce   : > { %p1145_p2 = scmp.ne.s32.totalorder %s1454_s23, %s1144_s26  ;;  %p1149_p5 = scmp.lt.s32.totalorder %s1454_s23, %s1508_s7 }
 0x1cf   : > { %p1150_p6 = scmp.lt.s32.totalorder %s1148_s20, %s1144_s26 }
 0x1d0   : > { %p1146_p3 = pnand %p1145_p2, %p1284_p10 }
 0x1d1   : > { %p1151_p7 = por %p1150_p6, %p1149_p5 }
 0x1d2   : > { %p1147_p4 = pneg %p1146_p3 }
 0x1d4   : > { %p1152_p8 = pnand %p1151_p7, %p1147_p4 }
 0x1d6   : > { %1155 = shalt.err (!%p1152_p8)
}
 0x1d7   : > { %s1200_s22 = smov 128   ;;  %s1201_s18 = smov 384  }
 0x1d8   : > { %s1202_s28 = smov 8  }
 0x1d9   : > { %1041 = dma.vmem_to_hbm [thread:$0]  (%p1284_p10), %s1456_s27, 384, %s1454_s23, %s1461_s25, %s1200_s22, %s1201_s18, %s1202_s28  }
 0x1da PF: > { %p1047_p9 = scmp.ge.s32.totalorder %s1192_s8, 2  ;;  %s856_s9 = sand.u32 1, %s1180_s29  }
 0x1db   : > { %s857_s10 = scalar_lea.sflag [#allocation5], %s856_s9 }
 0x1dc   : > { %p1044_p12 = pnand %p1047_p9, %p1288_p11 }
 0x1de   : > { %p1045_p13 = pneg %p1044_p12 }
 0x1e0   : > { %1175 = dma.done.wait (%p1045_p13), %s857_s10, 384  }
 0x1e1   : > { %1177 = vsyncadd (%p1045_p13), %s857_s10, 4294966912  ;;  %p23_p0 = scmp.ge.s32.totalorder %s1271_s11, 5   ;;  %s1511_s29 = smov %s1184_s30 }
 0x1e2   : > { %s1512_s30 = smov %s1188_s0  ;;  %s1513_s0 = smov %s1282_s14 }
 0x1e3   : > { %s1514_s8 = smov %s1271_s11  ;;  %25 = sbr.rel (!%p23_p0) target bundleno = 18 (0x12), region = 96 }
 0x1e8   :  { %862 = vsyncpa [#allocation5], 1 }
 0x1e9   :  { %864 = vsyncpa [#allocation5 + $0x1], 1 }

</bundles_post_ra>
